<compile_context>
chip_gen: v6e
topology: v6e:2x2x1
jax: 0.10.0
libtpu: 0.0.40
codegen_flags: <defaults>
</compile_context>

<pallas_src>
import jax
import jax.numpy as jnp
from jax import lax
from jax.experimental import pallas as pl
from jax.experimental.pallas import tpu as pltpu

NEG_SLOPE = 0.1
BN_EPS = 1e-5
LANES = 128


def _leaky(x):
    return jnp.where(x > 0, x, NEG_SLOPE * x)


def residual_kernel(x_ref, w1_ref, b1_ref, w2_ref, b2_ref, o_ref, h1pad_ref):
    """One grid step = (one image b, one row-tile t of that image).

    Lane-dense layout: one ref row == one image row packed as
    [x0_c0..c_{C-1}, x1_c0.., ..., x_{W-1}_c_{C-1}]  (W*C == 128 lanes).

      x_ref     : (H, 128)          whole image (resident across row tiles)
      w1_ref    : (128, W*Cmid)     kron(I_W, w1*s1)  -> 1x1 conv on dense rows
      b1_ref    : (1,  W*Cmid)      tile(b1, W)
      w2_ref    : (3, W*Cmid, 128)  per-ky width-fused 3x3 conv weights
                                    (kx shift + zero edges baked in)
      b2_ref    : (1, 128)          tile(b2, W)
      o_ref     : (row_tile, 128)   lane-dense output rows of this tile
      h1pad_ref : (H+2, W*Cmid)     h1 with one zero border row above/below
    """
    H = x_ref.shape[0]
    row_tile = o_ref.shape[0]
    kmid = w1_ref.shape[1]
    cd = w1_ref.dtype

    t = pl.program_id(1)
    row0 = pl.multiple_of(t * row_tile, row_tile)

    # ---- CBL1: 1x1 conv == ONE lane-dense matmul (BN scale folded into w1) ----
    x_img = x_ref[...]                                             # (H, 128)
    h1 = jnp.dot(x_img.astype(cd), w1_ref[...],
                 preferred_element_type=jnp.float32)               # (H, W*Cmid)
    h1 = _leaky(h1 + b1_ref[...])

    # ---- padded h1 scratch: only contiguous top/bottom zero rows remain ----
    # (rewritten fully every step -> safe under v7x per-core scratch sharding)
    zrow = jnp.zeros((1, kmid), cd)
    h1pad_ref[0:1, :] = zrow
    h1pad_ref[H + 1:H + 2, :] = zrow
    h1pad_ref[1:H + 1, :] = h1.astype(cd)

    # ---- CBL2: 3x3 conv == 3 accumulated lane-dense matmuls (one per ky) ----
    # The kx taps and the left/right zero padding live inside w2_ref[ky]
    # (banded kron matrices), so no im2col concat, no roll, no column scatter.
    rows = h1pad_ref[pl.ds(row0, row_tile), :]                     # ky = 0
    acc = jnp.dot(rows, w2_ref[0], preferred_element_type=jnp.float32)
    for ky in (1, 2):
        rows = h1pad_ref[pl.ds(row0 + ky, row_tile), :]
        acc += jnp.dot(rows, w2_ref[ky], preferred_element_type=jnp.float32)
    h2 = _leaky(acc + b2_ref[...])                                 # (row_tile, 128)

    # ---- residual add + store, fully lane-dense (128/128 lanes used) ----
    x_rows = x_ref[pl.ds(row0, row_tile), :]
    o_ref[...] = (x_rows.astype(jnp.float32) + h2).astype(o_ref.dtype)


def residual_layer(x, w1, s1, b1, w2, s2, b2, *,
                   row_tile=None, compute_dtype=jnp.float32,
                   vmem_limit_bytes=16 * 1024 * 1024):
    """x: (N, H, W, C) NHWC.  w1: (C, Cmid).  w2: (3, 3, Cmid, C) HWIO.
    s*/b*: folded (inference-mode) BatchNorm scale / bias, 1-D per channel.

    Requires W * C == 128 so one image row == one 128-lane vreg row."""
    N, H, W, C = x.shape
    Cmid = w1.shape[1]
    assert C % 2 == 0 and Cmid == C // 2
    assert W * C == LANES, "kernel requires W * C == 128 (lane-dense layout)"
    assert H % 8 == 0, "H must be a multiple of 8 for (8,128)-aligned tiles"
    if row_tile is None:                    # >=4 pipeline steps, 8-row aligned
        row_tile = max(8, (H // 4) // 8 * 8)
        if H % row_tile:
            row_tile = 8
    assert row_tile % 8 == 0 and H % row_tile == 0
    n_row_tiles = H // row_tile
    kmid = W * Cmid
    f32 = jnp.float32

    # --- fold BN scale into conv weights, then expand to lane-dense matrices ---
    w1s = (w1 * s1[None, :]).astype(f32)                        # (C, Cmid)
    w1_big = jnp.kron(jnp.eye(W, dtype=f32), w1s)               # (128, W*Cmid)
    b1_big = jnp.tile(b1.astype(f32), W)[None, :]               # (1, W*Cmid)

    w2s = (w2 * s2[None, None, None, :]).astype(f32)            # (3,3,Cmid,C)
    w2_rows = []
    for ky in range(3):
        m = jnp.zeros((kmid, LANES), f32)
        for kx in range(3):
            # shift[xp, x] = 1 iff xp == x + kx - 1 (out-of-range cols drop out
            # => the conv's zero padding along W is built into the weights).
            shift = jnp.eye(W, W, k=1 - kx, dtype=f32)
            m = m + jnp.kron(shift, w2s[ky, kx])                # (W*Cmid, 128)
        w2_rows.append(m)
    w2_big = jnp.stack(w2_rows)                                 # (3, W*Cmid, 128)
    b2_big = jnp.tile(b2.astype(f32), W)[None, :]               # (1, 128)

    w1_big = w1_big.astype(compute_dtype)
    w2_big = w2_big.astype(compute_dtype)

    # Lane-dense slab: one row == one image row == 128 lanes (free reinterpret).
    x_dense = x.reshape(N * H, LANES)

    T = n_row_tiles
    out_dense = pl.pallas_call(
        residual_kernel,
        out_shape=jax.ShapeDtypeStruct((N * H, LANES), x.dtype),
        grid_spec=pltpu.PrefetchScalarGridSpec(
            num_scalar_prefetch=0,
            grid=(N, n_row_tiles),
            in_specs=[
                pl.BlockSpec((H, LANES), lambda b, t: (b, 0)),       # x: whole image
                pl.BlockSpec((LANES, kmid), lambda b, t: (0, 0)),    # fused w1
                pl.BlockSpec((1, kmid), lambda b, t: (0, 0)),        # bn1 bias
                pl.BlockSpec((3, kmid, LANES), lambda b, t: (0, 0, 0)),  # fused w2
                pl.BlockSpec((1, LANES), lambda b, t: (0, 0)),       # bn2 bias
            ],
            out_specs=pl.BlockSpec((row_tile, LANES),
                                   lambda b, t: (b * T + t, 0)),
            scratch_shapes=[pltpu.VMEM((H + 2, kmid), compute_dtype)],
        ),
        compiler_params=pltpu.CompilerParams(
            # batch axis "parallel" (v7x megacore), row-tile axis sequential.
            dimension_semantics=("parallel", "arbitrary"),
            vmem_limit_bytes=vmem_limit_bytes),
    )(x_dense, w1_big, b1_big, w2_big, b2_big)
    return out_dense.reshape(N, H, W, C)


def _fold_bn(gamma, beta, mean, var):
    scale = gamma / jnp.sqrt(var + BN_EPS)
    bias = beta - mean * scale
    return scale, bias


def reference_forward(x, w1, s1, b1, w2, s2, b2):
    # pure-JAX reference (NHWC), inference-mode BN folded to scale/bias
    h1 = jnp.einsum('nhwc,cd->nhwd', x, w1)
    h1 = _leaky(h1 * s1 + b1)
    h2 = lax.conv_general_dilated(h1, w2, window_strides=(1, 1), padding='SAME',
                                  dimension_numbers=('NHWC', 'HWIO', 'NHWC'))
    h2 = _leaky(h2 * s2 + b2)
    return x + h2


if __name__ == "__main__":
    N, H, W, C = 2, 16, 16, 8           # W * C == 128 (lane-dense layout)
    Cmid = C // 2

    key = jax.random.PRNGKey(0)
    kx, kw1, kw2, kg1, kb1, km1, kv1, kg2, kb2, km2, kv2 = jax.random.split(key, 11)

    x = jax.random.normal(kx, (N, H, W, C), jnp.float32)

    # Conv weights. PyTorch layout (out,in,kh,kw) reorganized: 1x1 -> (Cin, Cmid),
    # 3x3 -> HWIO.
    w1 = jax.random.normal(kw1, (C, Cmid), jnp.float32) * 0.2
    w2 = jax.random.normal(kw2, (3, 3, Cmid, C), jnp.float32) * 0.1

    # BatchNorm params / running stats, folded to scale & bias (inference mode).
    g1 = jax.random.uniform(kg1, (Cmid,), jnp.float32, 0.5, 1.5)
    be1 = jax.random.normal(kb1, (Cmid,), jnp.float32) * 0.1
    m1 = jax.random.normal(km1, (Cmid,), jnp.float32) * 0.1
    v1 = jax.random.uniform(kv1, (Cmid,), jnp.float32, 0.5, 1.5)
    s1, b1 = _fold_bn(g1, be1, m1, v1)

    g2 = jax.random.uniform(kg2, (C,), jnp.float32, 0.5, 1.5)
    be2 = jax.random.normal(kb2, (C,), jnp.float32) * 0.1
    m2 = jax.random.normal(km2, (C,), jnp.float32) * 0.1
    v2 = jax.random.uniform(kv2, (C,), jnp.float32, 0.5, 1.5)
    s2, b2 = _fold_bn(g2, be2, m2, v2)

    ref = reference_forward(x, w1, s1, b1, w2, s2, b2)

    # f32 compute path (bit-faithful to the module): strict tolerance.
    out = residual_layer(x, w1, s1, b1, w2, s2, b2)
    out = jax.block_until_ready(out)
    assert out.shape == (N, H, W, C)
    assert jnp.allclose(out, ref, atol=1e-4, rtol=1e-4), "f32 mismatch vs JAX reference"

    # Optional bf16 matmul path (v6e/v7x); accumulation + residual add stay f32.
    out_bf16 = residual_layer(x, w1, s1, b1, w2, s2, b2,
                              compute_dtype=jnp.bfloat16)
    out_bf16 = jax.block_until_ready(out_bf16)
    assert jnp.allclose(out_bf16, ref, atol=2e-1, rtol=1e-1), "bf16 mismatch vs JAX reference"

    print("KERNEL_OK")
</pallas_src>

<mosaic_0001>
module attributes {stable_mosaic.version = 11 : i64} {
  func.func @residual_kernel(%arg0: i32, %arg1: i32, %arg2: memref<16x128xf32, #tpu.memory_space<vmem>>, %arg3: memref<128x64xf32, #tpu.memory_space<vmem>>, %arg4: memref<1x64xf32, #tpu.memory_space<vmem>>, %arg5: memref<3x64x128xf32, #tpu.memory_space<vmem>>, %arg6: memref<1x128xf32, #tpu.memory_space<vmem>>, %arg7: memref<8x128xf32, #tpu.memory_space<vmem>>, %arg8: memref<18x64xf32, #tpu.memory_space<vmem>>) attributes {dimension_semantics = [#tpu.dimension_semantics<parallel>, #tpu.dimension_semantics<arbitrary>], iteration_bounds = array<i64: 2, 2>, scalar_prefetch = 0 : i64, scratch_operands = 1 : i64, tpu.core_type = #tpu.core_type<tc>, window_params = [{transform_indices = @transform_0, window_bounds = array<i64: 16, 128>}, {pipeline_mode = #tpu.pipeline_mode<synchronous>, transform_indices = @transform_1, window_bounds = array<i64: 128, 64>}, {pipeline_mode = #tpu.pipeline_mode<synchronous>, transform_indices = @transform_2, window_bounds = array<i64: 1, 64>}, {pipeline_mode = #tpu.pipeline_mode<synchronous>, transform_indices = @transform_3, window_bounds = array<i64: 3, 64, 128>}, {pipeline_mode = #tpu.pipeline_mode<synchronous>, transform_indices = @transform_4, window_bounds = array<i64: 1, 128>}, {transform_indices = @transform_5, window_bounds = array<i64: 8, 128>}]} {
    %c8_i32 = arith.constant 8 : i32
    %0 = arith.muli %arg1, %c8_i32 : i32
    %1 = tpu.assume_multiple %0, 8 : i32
    %c0 = arith.constant 0 : index
    %c0_0 = arith.constant 0 : index
    %2 = vector.load %arg2[%c0, %c0_0] : memref<16x128xf32, #tpu.memory_space<vmem>>, vector<16x128xf32>
    %c0_1 = arith.constant 0 : index
    %c0_2 = arith.constant 0 : index
    %3 = vector.load %arg3[%c0_1, %c0_2] : memref<128x64xf32, #tpu.memory_space<vmem>>, vector<128x64xf32>
    %cst = arith.constant dense<0.000000e+00> : vector<16x64xf32>
    %4 = tpu.matmul %2, %3, %cst {dimension_numbers = #tpu.dot_dimension_numbers<[1], [0], [0], [1], [0, 0, 1, 1], [], []>} : vector<16x128xf32>, vector<128x64xf32>, vector<16x64xf32> -> vector<16x64xf32>
    %c0_3 = arith.constant 0 : index
    %c0_4 = arith.constant 0 : index
    %5 = vector.load %arg4[%c0_3, %c0_4] : memref<1x64xf32, #tpu.memory_space<vmem>>, vector<1x64xf32>
    %6 = vector.broadcast %5 : vector<1x64xf32> to vector<16x64xf32>
    %7 = arith.addf %4, %6 : vector<16x64xf32>
    %cst_5 = arith.constant 0.000000e+00 : f32
    %8 = vector.broadcast %cst_5 : f32 to vector<16x64xf32>
    %9 = arith.cmpf ogt, %7, %8 : vector<16x64xf32>
    %cst_6 = arith.constant 1.000000e-01 : f32
    %10 = vector.broadcast %cst_6 : f32 to vector<16x64xf32>
    %11 = arith.mulf %10, %7 : vector<16x64xf32>
    %12 = arith.select %9, %7, %11 : vector<16x64xi1>, vector<16x64xf32>
    %cst_7 = arith.constant 0.000000e+00 : f32
    %13 = vector.broadcast %cst_7 : f32 to vector<1x64xf32>
    %c0_8 = arith.constant 0 : index
    %c0_9 = arith.constant 0 : index
    %14 = vector.load %arg8[%c0_8, %c0_9] : memref<18x64xf32, #tpu.memory_space<vmem>>, vector<1x64xf32>
    tpu.vector_store %arg8[%c0_8, %c0_9], %13 {strides = array<i32>} : memref<18x64xf32, #tpu.memory_space<vmem>>, vector<1x64xf32>,
    %c17 = arith.constant 17 : index
    %c0_10 = arith.constant 0 : index
    %15 = vector.load %arg8[%c17, %c0_10] : memref<18x64xf32, #tpu.memory_space<vmem>>, vector<1x64xf32>
    tpu.vector_store %arg8[%c17, %c0_10], %13 {strides = array<i32>} : memref<18x64xf32, #tpu.memory_space<vmem>>, vector<1x64xf32>,
    %c1 = arith.constant 1 : index
    %c0_11 = arith.constant 0 : index
    %16 = vector.load %arg8[%c1, %c0_11] : memref<18x64xf32, #tpu.memory_space<vmem>>, vector<16x64xf32>
    tpu.vector_store %arg8[%c1, %c0_11], %12 {strides = array<i32>} : memref<18x64xf32, #tpu.memory_space<vmem>>, vector<16x64xf32>,
    %17 = arith.index_cast %1 : i32 to index
    %c0_12 = arith.constant 0 : index
    %18 = vector.load %arg8[%17, %c0_12] : memref<18x64xf32, #tpu.memory_space<vmem>>, vector<8x64xf32>
    %c0_13 = arith.constant 0 : index
    %c0_14 = arith.constant 0 : index
    %c0_15 = arith.constant 0 : index
    %19 = vector.load %arg5[%c0_13, %c0_14, %c0_15] : memref<3x64x128xf32, #tpu.memory_space<vmem>>, vector<1x64x128xf32>
    %20 = vector.shape_cast %19 : vector<1x64x128xf32> to vector<64x128xf32>
    %cst_16 = arith.constant dense<0.000000e+00> : vector<8x128xf32>
    %21 = tpu.matmul %18, %20, %cst_16 {dimension_numbers = #tpu.dot_dimension_numbers<[1], [0], [0], [1], [0, 0, 1, 1], [], []>} : vector<8x64xf32>, vector<64x128xf32>, vector<8x128xf32> -> vector<8x128xf32>
    %c1_i32 = arith.constant 1 : i32
    %22 = arith.addi %1, %c1_i32 : i32
    %23 = arith.index_cast %22 : i32 to index
    %c0_17 = arith.constant 0 : index
    %24 = vector.load %arg8[%23, %c0_17] : memref<18x64xf32, #tpu.memory_space<vmem>>, vector<8x64xf32>
    %c1_18 = arith.constant 1 : index
    %c0_19 = arith.constant 0 : index
    %c0_20 = arith.constant 0 : index
    %25 = vector.load %arg5[%c1_18, %c0_19, %c0_20] : memref<3x64x128xf32, #tpu.memory_space<vmem>>, vector<1x64x128xf32>
    %26 = vector.shape_cast %25 : vector<1x64x128xf32> to vector<64x128xf32>
    %cst_21 = arith.constant dense<0.000000e+00> : vector<8x128xf32>
    %27 = tpu.matmul %24, %26, %cst_21 {dimension_numbers = #tpu.dot_dimension_numbers<[1], [0], [0], [1], [0, 0, 1, 1], [], []>} : vector<8x64xf32>, vector<64x128xf32>, vector<8x128xf32> -> vector<8x128xf32>
    %28 = arith.addf %21, %27 : vector<8x128xf32>
    %c2_i32 = arith.constant 2 : i32
    %29 = arith.addi %1, %c2_i32 : i32
    %30 = arith.index_cast %29 : i32 to index
    %c0_22 = arith.constant 0 : index
    %31 = vector.load %arg8[%30, %c0_22] : memref<18x64xf32, #tpu.memory_space<vmem>>, vector<8x64xf32>
    %c2 = arith.constant 2 : index
    %c0_23 = arith.constant 0 : index
    %c0_24 = arith.constant 0 : index
    %32 = vector.load %arg5[%c2, %c0_23, %c0_24] : memref<3x64x128xf32, #tpu.memory_space<vmem>>, vector<1x64x128xf32>
    %33 = vector.shape_cast %32 : vector<1x64x128xf32> to vector<64x128xf32>
    %cst_25 = arith.constant dense<0.000000e+00> : vector<8x128xf32>
    %34 = tpu.matmul %31, %33, %cst_25 {dimension_numbers = #tpu.dot_dimension_numbers<[1], [0], [0], [1], [0, 0, 1, 1], [], []>} : vector<8x64xf32>, vector<64x128xf32>, vector<8x128xf32> -> vector<8x128xf32>
    %35 = arith.addf %28, %34 : vector<8x128xf32>
    %c0_26 = arith.constant 0 : index
    %c0_27 = arith.constant 0 : index
    %36 = vector.load %arg6[%c0_26, %c0_27] : memref<1x128xf32, #tpu.memory_space<vmem>>, vector<1x128xf32>
    %37 = vector.broadcast %36 : vector<1x128xf32> to vector<8x128xf32>
    %38 = arith.addf %35, %37 : vector<8x128xf32>
    %cst_28 = arith.constant 0.000000e+00 : f32
    %39 = vector.broadcast %cst_28 : f32 to vector<8x128xf32>
    %40 = arith.cmpf ogt, %38, %39 : vector<8x128xf32>
    %cst_29 = arith.constant 1.000000e-01 : f32
    %41 = vector.broadcast %cst_29 : f32 to vector<8x128xf32>
    %42 = arith.mulf %41, %38 : vector<8x128xf32>
    %43 = arith.select %40, %38, %42 : vector<8x128xi1>, vector<8x128xf32>
    %44 = arith.index_cast %1 : i32 to index
    %c0_30 = arith.constant 0 : index
    %45 = vector.load %arg2[%44, %c0_30] : memref<16x128xf32, #tpu.memory_space<vmem>>, vector<8x128xf32>
    %46 = arith.addf %45, %43 : vector<8x128xf32>
    %c0_31 = arith.constant 0 : index
    %c0_32 = arith.constant 0 : index
    %47 = vector.load %arg7[%c0_31, %c0_32] : memref<8x128xf32, #tpu.memory_space<vmem>>, vector<8x128xf32>
    tpu.vector_store %arg7[%c0_31, %c0_32], %46 {strides = array<i32>} : memref<8x128xf32, #tpu.memory_space<vmem>>, vector<8x128xf32>,
    return
  }
  func.func @transform_0(%arg0: i32, %arg1: i32) -> (i32, i32) {
    %c0_i32 = arith.constant 0 : i32
    %c0_i32_0 = arith.constant 0 : i32
    return %arg0, %c0_i32 : i32, i32
  }
  func.func @transform_1(%arg0: i32, %arg1: i32) -> (i32, i32) {
    %c0_i32 = arith.constant 0 : i32
    %c0_i32_0 = arith.constant 0 : i32
    %c0_i32_1 = arith.constant 0 : i32
    return %c0_i32, %c0_i32_0 : i32, i32
  }
  func.func @transform_2(%arg0: i32, %arg1: i32) -> (i32, i32) {
    %c0_i32 = arith.constant 0 : i32
    %c0_i32_0 = arith.constant 0 : i32
    %c0_i32_1 = arith.constant 0 : i32
    return %c0_i32, %c0_i32_0 : i32, i32
  }
  func.func @transform_3(%arg0: i32, %arg1: i32) -> (i32, i32, i32) {
    %c0_i32 = arith.constant 0 : i32
    %c0_i32_0 = arith.constant 0 : i32
    %c0_i32_1 = arith.constant 0 : i32
    %c0_i32_2 = arith.constant 0 : i32
    return %c0_i32, %c0_i32_0, %c0_i32_1 : i32, i32, i32
  }
  func.func @transform_4(%arg0: i32, %arg1: i32) -> (i32, i32) {
    %c0_i32 = arith.constant 0 : i32
    %c0_i32_0 = arith.constant 0 : i32
    %c0_i32_1 = arith.constant 0 : i32
    return %c0_i32, %c0_i32_0 : i32, i32
  }
  func.func @transform_5(%arg0: i32, %arg1: i32) -> (i32, i32) {
    %c2_i32 = arith.constant 2 : i32
    %0 = arith.muli %arg0, %c2_i32 : i32
    %1 = arith.addi %0, %arg1 : i32
    %c0_i32 = arith.constant 0 : i32
    %c0_i32_0 = arith.constant 0 : i32
    return %1, %c0_i32 : i32, i32
  }
}

</mosaic_0001>

<bundles_post_ra>
// kernel: tpu_custom_call.1
= control target key start
LH: loop header
LB: loop body
LE: loop exit
PB: predicated region body
PF: predicated region fallthrough
CT: control target
= control target key end

     0   :  { %s1577_s0 = inlined_call_operand.hbm [shape: f32[32,128], index: 0, kind: input, shape index: {}]   ;;  %s1578_s1 = inlined_call_operand.vmem [shape: f32[128,64], index: 1, kind: input, shape index: {}]   ;;  %s1579_s2 = inlined_call_operand.vmem [shape: f32[1,64], index: 2, kind: input, shape index: {}]   ;;  %s1580_s3 = inlined_call_operand.vmem [shape: f32[3,64,128], index: 3, kind: input, shape index: {}]   ;;  %s1581_s4 = inlined_call_operand.vmem [shape: f32[1,128], index: 4, kind: input, shape index: {}]   ;;  %s1582_s5 = inlined_call_operand.hbm [shape: f32[32,128], index: 5, kind: output, shape index: {}]  }
   0x1   :  { %1588 = sst [smem:[#allocation13_spill]] %s1581_s4 }
   0x2   :  { %1589 = sst [smem:[#allocation14_spill]] %s1582_s5 }
   0x3   :  { %10 = vsyncpa [#allocation4], 0 }
   0x4   :  { %12 = vsyncpa [#allocation4 + $0x1], 0 }
   0x5   :  { %13 = vsyncpa [#allocation5], 0 }
   0x6   :  { %15 = vsyncpa [#allocation5 + $0x1], 0  ;;  %s1226_s18 = smov 0   ;;  %s1228_s19 = smov 0  }
   0x7   :  { %s1230_s20 = smov 0   ;;  %s1232_s21 = smov 0  }
   0x8   :  { %s1234_s22 = smov 0   ;;  %s1236_s23 = smov 0  }
   0x9   :  { %s1238_s24 = smov 0   ;;  %s1240_s25 = smov 0  }
   0xa   :  { %s1242_s26 = smov 0   ;;  %s1244_s27 = smov 0  }
   0xb   :  { %s1246_s28 = smov 0  }
   0xc LB: > { %1590 = sst [smem:[#allocation9_spill]] %s1180_s26  ;;  %s753_s29 = sadd.s32 4294967295, %s1188_s28   ;;  %s1188_s28 = sphi %s1246_s28, %s21_s28   ;;  %s1184_s27 = sphi %s1244_s27, %s1605_s27   ;;  %s1180_s26 = sphi %s1242_s26, %s1604_s26   ;;  %s1176_s25 = sphi %s1240_s25, %s1603_s25   ;;  %s1172_s24 = sphi %s1238_s24, %s1602_s24   ;;  %s1168_s23 = sphi %s1236_s23, %s1611_s23   ;;  %s1164_s22 = sphi %s1234_s22, %s1610_s22   ;;  %s1160_s21 = sphi %s1232_s21, %s1609_s21   ;;  %s1156_s20 = sphi %s1230_s20, %s1608_s20   ;;  %s1152_s19 = sphi %s1228_s19, %s1607_s19   ;;  %s1148_s18 = sphi %s1226_s18, %s1606_s18  }
   0xd   : > { %1591 = sst [smem:[#allocation10_spill]] %s1184_s27  ;;  %s754_s30 = sadd.s32 4294967294, %s1188_s28  }
   0xe   : > { %s30_s6 = sadd.s32 1, %s1180_s26  ;;  %s33_s7 = sadd.s32 1, %s1184_s27 }
   0xf   : > { %p31_p0 = scmp.ge.s32.totalorder %s30_s6, 2  ;;  %s40_s8 = sadd.s32 1, %s1168_s23 }
  0x10   : > { %p47_p1 = scmp.ne.s32.totalorder %s1168_s23, %s1164_s22  ;;  %p48_p2 = scmp.eq.s32.totalorder %s1188_s28, 0 }
  0x11   : > { %s1613_s6 = smov (%p31_p0, %s30_s6), 0  ;;  %s1615_s7 = smov (!%p31_p0, %s33_s7), %s1184_s27 }
  0x12   : > { %1592 = sst [smem:[#allocation11_spill]] %s1613_s6  ;;  %p1290_p3 = por %p48_p2, %p47_p1 }
  0x13   : > { %p53_p4 = scmp.ne.s32.totalorder %s1164_s22, %s1160_s21  ;;  %p35_p5 = scmp.ge.s32.totalorder %s1615_s7, 2 }
  0x14   : > { %p54_p6 = scmp.eq.s32.totalorder %s753_s29, 0  ;;  %s755_s10 = sshll.u32 %s1184_s27, 1 }
  0x15   : > { %s154_s11 = sadd.s32 1, %s1156_s20  ;;  %s1617_s7 = smov (%p35_p5, %s1615_s7), 0 }
  0x16   : > { %1594 = sst [smem:[#allocation12_spill]] %s1617_s7  ;;  %p1299_p7 = por %p54_p6, %p53_p4 }
  0x17   : > { %s148_s13 = sadd.s32 %s1180_s26, %s755_s10  ;;  %s37_s14 = ssub.s32 %s1184_s27, %s1617_s7 }
  0x18   : > { %s756_s15 = sshll.u32 %s1617_s7, 1  ;;  %p38_p8 = scmp.eq.s32.totalorder %s37_s14, 0 }
  0x19   : > { %s150_s16 = sadd.s32 %s756_s15, %s1613_s6  ;;  %p164_p9 = scmp.ne.s32.totalorder %s1156_s20, %s1152_s19 }
  0x1a   : > { %s151_s17 = ssub.s32 %s148_s13, %s150_s16  ;;  %p165_p11 = scmp.eq.s32.totalorder %s753_s29, 3 }
  0x1b   : > { %s1311_s21 = scalar_select %p38_p8, %s1168_s23, %s40_s8  }
  0x1c   : > { %p152_p10 = scmp.eq.s32.totalorder %s151_s17, 0  ;;  %p170_p12 = scmp.ne.s32.totalorder %s1152_s19, %s1148_s18 }
  0x1d   : > { %p171_p13 = scmp.eq.s32.totalorder %s754_s30, 3  ;;  %p1318_p0 = por %p165_p11, %p164_p9 }
  0x1e   : > { %s1316_s5 = scalar_select %p152_p10, %s1156_s20, %s154_s11  }
  0x1f   : > { %p1322_p1 = por %p171_p13, %p170_p12  ;;  %p946_p2 = scmp.lt.s32.totalorder %s1188_s28, 4 }
  0x20   : > { %s203_s13 = sand.u32 1, %s1168_s23   ;;  %s796_s14 = sshll.u32 %s1184_s27, 8 }
  0x21   : > { %s759_s15 = sshll.u32 %s203_s13, 4  ;;  %s213_s29 = scalar_lea.hbm %s1577_s0, %s796_s14 }
  0x22   : > { %s207_s17 = scalar_lea.vmem [#allocation3], %s759_s15  ;;  %p1334_p4 = pnand %p946_p2, %p1290_p3 }
  0x23   : > { %s214_s30 = sshll.u32 %s207_s17, 4  ;;  %s204_s7 = scalar_lea.sflag [#allocation4], %s203_s13  ;;  %s215_s30 = int_to_ptr.vmem [resolvable:$true] %s214_s30 }
  0x24   : > { %p1042_p5 = pneg %p1334_p4  ;;  %s1053_s6 = scalar_lea.vmem %s215_s30, 256 }
  0x25   : > { %p1054_p6 = scmp.ne.s32.totalorder %s215_s30, %s1053_s6  ;;  %s1190_s27 = smov [#allocation3]  }
  0x26   : > { %s1058_s26 = sshll.u32 %s1190_s27, 4  ;;  %s1059_s26 = int_to_ptr.vmem [resolvable:$false] %s1058_s26 }
  0x27   : > { %p1056_p8 = pnand %p1054_p6, %p1042_p5  ;;  %s1060_s14 = scalar_lea.vmem %s1059_s26, 512 }
  0x28   : > { %p1061_p10 = scmp.lt.s32.totalorder %s215_s30, %s1059_s26  ;;  %p1062_p11 = scmp.lt.s32.totalorder %s1060_s14, %s1053_s6 }
  0x29   : > { %p1057_p9 = pneg %p1056_p8 }
  0x2a   : > { %p1063_p12 = por %p1062_p11, %p1061_p10 }
  0x2c   : > { %p1064_p3 = pnand %p1063_p12, %p1057_p9 }
  0x2e   : > { %1067 = shalt.err (!%p1064_p3)
}
  0x2f   : > { %s1191_s9 = smov 128   ;;  %s1192_s13 = smov 8  }
  0x30   : > { %941 = dma.hbm_to_vmem [thread:$0]  (!%p1334_p4), %s213_s29, 256, %s215_s30, %s204_s7, %s1191_s9, %s1191_s9, %s1192_s13  }
  0x31   : > { %p762_p13 = scmp.ge.s32.totalorder %s1188_s28, 1  ;;  %p222_p2 = scmp.lt.s32.totalorder %s1188_s28, 5 }
  0x33   : > { %p223_p5 = pnand %p762_p13, %p222_p2 }
  0x34   : > { %s228_s27 = sand.u32 (!%p223_p5), 1, %s1164_s22  }
  0x35   : > { %226 = sbr.rel (%p223_p5) target bundleno = 533 (0x215), region = 40  ;;  %s763_s15 = sshll.u32 (!%p223_p5), %s228_s27, 4 }
  0x36   : > { %s229_s26 = scalar_lea.sflag (!%p223_p5), [#allocation4], %s228_s27  ;;  %s1345_s6 = scalar_lea.vmem (!%p223_p5), [#allocation3], %s763_s15 }
  0x3a   : > { %1139 = dma.done.wait (%p1299_p7), %s229_s26, 256  }
  0x3b   : > { %1141 = vsyncadd (%p1299_p7), %s229_s26, 4294967040  ;;  %v1193_v0 = vmov 0.0   ;;  %v280_v1 = vld [vmem:[%s1578_s1 + $0x78] sm:$0xff]  ;;  %v279_v2 = vld [vmem:[%s1578_s1 + $0x70] sm:$0xff]  ;;  %vm369_vm0 = vcmask 516096   ;;  %vm1194_vm1 = vmmov 0  }
  0x3c   : > { %877 = vmatprep.subr.mxu1 %v1193_v0  ;;  %842 = vmatprep.subr.mxu0 %v280_v1  ;;  %v278_v3 = vld [vmem:[%s1578_s1 + $0x68] sm:$0xff]  ;;  %v277_v4 = vld [vmem:[%s1578_s1 + $0x60] sm:$0xff]  ;;  %v276_v6 = vld [vmem:[%s1578_s1 + $0x58] sm:$0xff]  ;;  %370 = vst.msk [vmem:[#allocation2] sm:$0x1] %vm369_vm0, %v1193_v0  ;;  %vm372_vm3 = vcmask 523264  }
  0x3d   : > { %843 = vmatpush3.msra.mxu0 %v280_v1  ;;  %v263_v5 = vld [vmem:[%s1345_s6] sm:$0xff]  ;;  %v275_v7 = vld [vmem:[%s1578_s1 + $0x50] sm:$0xff]  ;;  %v273_v9 = vld [vmem:[%s1578_s1 + $0x40] sm:$0xff]  ;;  %371 = vst.msk [vmem:[#allocation2 + $0x11] sm:$0x1] %vm369_vm0, %v1193_v0  ;;  %893 = vmatprep.mubr.msk.f32.mxu1 %vm1194_vm1, %v1193_v0  ;;  %s765_s13 = sshll.u32 %s1172_s24, 3 }
  0x3e   : > { %844 = vmatprep.subr.mxu0 %v279_v2  ;;  %874 = vmatprep.mubr.f32.mxu0 %v263_v5  ;;  %v274_v8 = vld [vmem:[%s1578_s1 + $0x48] sm:$0xff]  ;;  %v272_v10 = vld [vmem:[%s1578_s1 + $0x38] sm:$0xff]  ;;  %v271_v11 = vld [vmem:[%s1578_s1 + $0x30] sm:$0xff]  ;;  %s375_s26 = scalar_lea.vmem [#allocation2], %s765_s13  ;;  %s256_s16 = sand.u32 1, %s1152_s19  }
  0x3f   : > { %845 = vmatpush3.msra.mxu0 %v279_v2  ;;  %v270_v12 = vld [vmem:[%s1578_s1 + $0x28] sm:$0xff]  ;;  %v269_v13 = vld [vmem:[%s1578_s1 + $0x20] sm:$0xff]  ;;  %v268_v14 = vld [vmem:[%s1578_s1 + $0x18] sm:$0xff]  ;;  %s764_s29 = sshll.u32 %s256_s16, 3  ;;  %s792_s17 = sshll.u32 %s1176_s25, 1 }
  0x40   : > { %846 = vmatprep.subr.mxu0 %v278_v3  ;;  %v267_v15 = vld [vmem:[%s1578_s1 + $0x10] sm:$0xff]  ;;  %v266_v16 = vld [vmem:[%s1578_s1 + $0x8] sm:$0xff]  ;;  %v265_v17 = vld [vmem:[%s1578_s1] sm:$0xff]  ;;  %s1599_s11 = sld [smem:[#allocation13_spill]]  ;;  %s640_s14 = scalar_lea.vmem %s1345_s6, %s765_s13 [#allocation3] }
  0x41   : > { %847 = vmatpush3.msra.mxu0 %v278_v3  ;;  %v264_v18 = vld [vmem:[%s1345_s6 + $0x8] sm:$0xff]  ;;  %v776_v19 = vld [vmem:[%s1580_s3 + $0x78] sm:$0xff]  ;;  %v774_v23 = vld [vmem:[%s1580_s3 + $0x68] sm:$0xff]  ;;  %s258_s27 = scalar_lea.vmem [#allocation6], %s764_s29  ;;  %s1600_s8 = sld [smem:[#allocation14_spill]] }
  0x42   : > { %848 = vmatprep.subr.mxu0 %v277_v4  ;;  %878 = vmatpush3.msra.mxu1 %v776_v19  ;;  %v788_v20 = vld [vmem:[%s1580_s3 + $0xb8] sm:$0xff]  ;;  %v775_v21 = vld [vmem:[%s1580_s3 + $0x70] sm:$0xff]  ;;  %v786_v24 = vld [vmem:[%s1580_s3 + $0xa8] sm:$0xff]  ;;  %s660_s15 = sshll.u32 %s258_s27, 4  ;;  %s645_s12 = scalar_lea.sflag [#allocation5], %s256_s16  ;;  %s661_s15 = int_to_ptr.vmem [resolvable:$true] %s660_s15 }
  0x43   : > { %849 = vmatpush3.msra.mxu0 %v277_v4  ;;  %879 = vmatprep.subr.mxu1 %v1193_v0  ;;  %v787_v22 = vld [vmem:[%s1580_s3 + $0xb0] sm:$0xff]  ;;  %v773_v25 = vld [vmem:[%s1580_s3 + $0x60] sm:$0xff]  ;;  %v772_v27 = vld [vmem:[%s1580_s3 + $0x58] sm:$0xff] }
  0x44   : > { %850 = vmatprep.subr.mxu0 %v276_v6  ;;  %880 = vmatpush3.msra.mxu1 %v775_v21  ;;  %v785_v26 = vld [vmem:[%s1580_s3 + $0xa0] sm:$0xff]  ;;  %v784_v28 = vld [vmem:[%s1580_s3 + $0x98] sm:$0xff]  ;;  %v771_v29 = vld [vmem:[%s1580_s3 + $0x50] sm:$0xff] }
  0x45   : > { %851 = vmatpush3.msra.mxu0 %v276_v6  ;;  %881 = vmatprep.subr.mxu1 %v1193_v0  ;;  %v783_v30 = vld [vmem:[%s1580_s3 + $0x90] sm:$0xff]  ;;  %v770_v31 = vld [vmem:[%s1580_s3 + $0x48] sm:$0xff]  ;;  %v769_v33 = vld [vmem:[%s1580_s3 + $0x40] sm:$0xff] }
  0x46   : > { %852 = vmatprep.subr.mxu0 %v275_v7  ;;  %882 = vmatpush3.msra.mxu1 %v774_v23  ;;  %v782_v32 = vld [vmem:[%s1580_s3 + $0x88] sm:$0xff]  ;;  %v781_v34 = vld [vmem:[%s1580_s3 + $0x80] sm:$0xff]  ;;  %v384_v44 = vld [vmem:[%s1580_s3 + $0x38] sm:$0xff] }
  0x47   : > { %853 = vmatpush3.msra.mxu0 %v275_v7  ;;  %883 = vmatprep.subr.mxu1 %v1193_v0  ;;  %v766_v35 = vld [vmem:[%s1579_s2] ss:$0 sm:$0xff]  ;;  %v383_v47 = vld [vmem:[%s1580_s3 + $0x30] sm:$0xff]  ;;  %v382_v48 = vld [vmem:[%s1580_s3 + $0x28] sm:$0xff] }
  0x48   : > { %854 = vmatprep.subr.mxu0 %v274_v8  ;;  %884 = vmatpush3.msra.mxu1 %v773_v25  ;;  %v381_v49 = vld [vmem:[%s1580_s3 + $0x20] sm:$0xff]  ;;  %v380_v50 = vld [vmem:[%s1580_s3 + $0x18] sm:$0xff]  ;;  %v379_v51 = vld [vmem:[%s1580_s3 + $0x10] sm:$0xff] }
  0x49   : > { %855 = vmatpush3.msra.mxu0 %v274_v8  ;;  %885 = vmatprep.subr.mxu1 %v1193_v0  ;;  %v378_v52 = vld [vmem:[%s1580_s3 + $0x8] sm:$0xff]  ;;  %v377_v53 = vld [vmem:[%s1580_s3] sm:$0xff] }
  0x4a   : > { %856 = vmatprep.subr.mxu0 %v273_v9  ;;  %886 = vmatpush3.msra.mxu1 %v772_v27  ;;  %v790_v61 = vld [vmem:[%s1599_s11] ss:$0 sm:$0xff]  ;;  %s1068_s11 = scalar_lea.vmem %s661_s15, 128 }
  0x4b   : > { %857 = vmatpush3.msra.mxu0 %v273_v9  ;;  %887 = vmatprep.subr.mxu1 %v1193_v0  ;;  %v641_v2 = vld [vmem:[%s640_s14] sm:$0xff]  ;;  %p1069_p7 = scmp.ne.s32.totalorder %s661_s15, %s1068_s11 }
  0x4c   : > { %858 = vmatprep.subr.mxu0 %v272_v10  ;;  %888 = vmatpush3.msra.mxu1 %v771_v29 }
  0x4d   : > { %859 = vmatpush3.msra.mxu0 %v272_v10  ;;  %889 = vmatprep.subr.mxu1 %v1193_v0  ;;  %p1070_p4 = pnand %p1069_p7, %p1318_p0 }
  0x4e   : > { %860 = vmatprep.subr.mxu0 %v271_v11  ;;  %890 = vmatpush3.msra.mxu1 %v770_v31 }
  0x4f   : > { %861 = vmatpush3.msra.mxu0 %v271_v11  ;;  %891 = vmatprep.subr.mxu1 %v1193_v0  ;;  %p1071_p6 = pneg %p1070_p4 }
  0x50   : > { %862 = vmatprep.subr.mxu0 %v270_v12  ;;  %892 = vmatpush3.msra.mxu1 %v769_v33 }
  0x51   : > { %863 = vmatpush3.msra.mxu0 %v270_v12  ;;  %896 = vmatprep.subr.mxu1 %v1193_v0 }
  0x52   : > { %864 = vmatprep.subr.mxu0 %v269_v13 }
  0x53   : > { %865 = vmatpush3.msra.mxu0 %v269_v13 }
  0x54   : > { %866 = vmatprep.subr.mxu0 %v268_v14 }
  0x55   : > { %867 = vmatpush3.msra.mxu0 %v268_v14 }
  0x56   : > { %868 = vmatprep.subr.mxu0 %v267_v15 }
  0x57   : > { %869 = vmatpush3.msra.mxu0 %v267_v15 }
  0x58   : > { %870 = vmatprep.subr.mxu0 %v266_v16 }
  0x59   : > { %871 = vmatpush3.msra.mxu0 %v266_v16 }
  0x5a   : > { %872 = vmatprep.subr.mxu0 %v265_v17 }
  0x5b   : > { %873 = vmatpush3.msra.mxu0 %v265_v17 }
  0x5c   : > { %875 = vmatmul.mubr.f32.vlgmr.msra.gmra.mxu0 %v264_v18  ;;  %915 = vmatprep.subr.mxu0 %v1193_v0 }
  0x5d   : > { %916 = vmatpush3.msra.mxu0 %v788_v20  ;;  %931 = vmatprep.mubr.msk.f32.mxu0 %vm1194_vm1, %v1193_v0 }
  0x5e   : > { %917 = vmatprep.subr.mxu0 %v1193_v0 }
  0x5f   : > { %918 = vmatpush3.msra.mxu0 %v787_v22 }
  0x60   : > { %919 = vmatprep.subr.mxu0 %v1193_v0 }
  0x61   : > { %920 = vmatpush3.msra.mxu0 %v786_v24 }
  0x62   : > { %921 = vmatprep.subr.mxu0 %v1193_v0 }
  0x63   : > { %922 = vmatpush3.msra.mxu0 %v785_v26 }
  0x64   : > { %923 = vmatprep.subr.mxu0 %v1193_v0 }
  0x65   : > { %924 = vmatpush3.msra.mxu0 %v784_v28 }
  0x66   : > { %925 = vmatprep.subr.mxu0 %v1193_v0 }
  0x67   : > { %926 = vmatpush3.msra.mxu0 %v783_v30 }
  0x68   : > { %927 = vmatprep.subr.mxu0 %v1193_v0 }
  0x69   : > { %928 = vmatpush3.msra.mxu0 %v782_v32 }
  0x6a   : > { %929 = vmatprep.subr.mxu0 %v1193_v0 }
  0x6b   : > { %930 = vmatpush3.msra.mxu0 %v781_v34 }
 0x11c   : > { %v876_v36 = vpop.f32.mrf.mxu0 }
 0x11d   : > { %v360_v37 = vadd.f32 %v876_v36, %v766_v35 }
 0x11e   : > { %v354_v38 = vpop.f32.mrf.mxu0 }
 0x11f   : > { %vm364_vm2 = vcmp.gt.f32.partialorder %v360_v37, 0.0  ;;  %v366_v39 = vmul.f32 0.1, %v360_v37  ;;  %v355_v40 = vadd.f32 %v766_v35, %v354_v38 }
 0x121   : > { %v368_v41 = vsel %vm364_vm2, %v360_v37, %v366_v39  ;;  %vm363_vm4 = vcmp.gt.f32.partialorder %v355_v40, 0.0  ;;  %v365_v42 = vmul.f32 0.1, %v355_v40 }
 0x122   : > { %374 = vst.msk [vmem:[#allocation2 + $0x9] sm:$0xff] %vm372_vm3, %v368_v41 }
 0x123   : > { %v367_v43 = vsel %vm363_vm4, %v355_v40, %v365_v42 }
 0x124   : > { %373 = vst.msk [vmem:[#allocation2 + $0x1] sm:$0xff] %vm372_vm3, %v367_v43 }
 0x12b   : > { %v768_v45 = vld [vmem:[%s375_s26 + $0x1] sm:$0xff] }
 0x12c   : > { %v780_v46 = vld [vmem:[%s375_s26 + $0x2] sm:$0xff]  ;;  %894 = vmatmul.mubr.msk.f32.vlgmr.msra.gmra.mxu1 %vm372_vm3, %v768_v45 }
 0x12d   : > { %932 = vmatmul.mubr.msk.f32.vlgmr.msra.gmra.mxu0 %vm372_vm3, %v780_v46  ;;  %897 = vmatpush3.msra.mxu1 %v384_v44  ;;  %v376_v54 = vld [vmem:[%s375_s26] sm:$0xff]  ;;  %s653_s26 = sadd.s32 %s1172_s24, %s792_s17  ;;  %s1195_s24 = smov [#allocation6]  }
 0x12e   : > { %912 = vmatprep.mubr.msk.f32.mxu1 %vm1194_vm1, %v1193_v0  ;;  %898 = vmatprep.subr.mxu1 %v1193_v0  ;;  %s793_s9 = sshll.u32 %s653_s26, 7  ;;  %s1072_s6 = sshll.u32 %s1195_s24, 4  ;;  %s1073_s6 = int_to_ptr.vmem [resolvable:$false] %s1072_s6 }
 0x12f   : > { %899 = vmatpush3.msra.mxu1 %v383_v47  ;;  %s658_s30 = scalar_lea.hbm %s1600_s8, %s793_s9  ;;  %s1074_s13 = scalar_lea.vmem %s1073_s6, 256 }
 0x130   : > { %900 = vmatprep.subr.mxu1 %v1193_v0  ;;  %p1075_p8 = scmp.lt.s32.totalorder %s661_s15, %s1073_s6  ;;  %p1076_p9 = scmp.lt.s32.totalorder %s1074_s13, %s1068_s11 }
 0x131   : > { %901 = vmatpush3.msra.mxu1 %v382_v48 }
 0x132   : > { %902 = vmatprep.subr.mxu1 %v1193_v0  ;;  %p1077_p10 = por %p1076_p9, %p1075_p8 }
 0x133   : > { %903 = vmatpush3.msra.mxu1 %v381_v49 }
 0x134   : > { %904 = vmatprep.subr.mxu1 %v1193_v0  ;;  %p1078_p11 = pnand %p1077_p10, %p1071_p6 }
 0x135   : > { %905 = vmatpush3.msra.mxu1 %v380_v50 }
 0x136   : > { %906 = vmatprep.subr.mxu1 %v1193_v0 }
 0x137   : > { %907 = vmatpush3.msra.mxu1 %v379_v51 }
 0x138   : > { %908 = vmatprep.subr.mxu1 %v1193_v0 }
 0x139   : > { %909 = vmatpush3.msra.mxu1 %v378_v52 }
 0x13a   : > { %910 = vmatprep.subr.mxu1 %v1193_v0 }
 0x13b   : > { %911 = vmatpush3.msra.mxu1 %v377_v53 }
 0x13c   : > { %913 = vmatmul.mubr.msk.f32.vlgmr.msra.gmra.mxu1 %vm372_vm3, %v376_v54 }
 0x1ec   : > { %v466_v55 = vpop.f32.mrf.mxu1 }
 0x1ed   : > { %v624_v56 = vpop.f32.mrf.mxu0 }
 0x1ee   : > { %v895_v57 = vpop.f32.mrf.mxu1 }
 0x1ef   : > { %v933_v58 = vpop.f32.mrf.mxu0 }
 0x1fc   : > { %v539_v59 = vpop.f32.mrf.mxu1 }
 0x1fd   : > { %v540_v60 = vadd.f32 %v539_v59, %v466_v55 }
 0x1fe   : > { %v914_v62 = vpop.f32.mrf.mxu1 }
 0x1ff   : > { %v628_v63 = vadd.f32 %v624_v56, %v540_v60 }
 0x201   : > { %v636_v0 = vadd.f32 %v790_v61, %v628_v63 }
 0x203   : > { %vm637_vm5 = vcmp.gt.f32.partialorder %v636_v0, 0.0  ;;  %v638_v1 = vmul.f32 0.1, %v636_v0 }
 0x205   : > { %v639_v3 = vsel %vm637_vm5, %v636_v0, %v638_v1 }
 0x206   : > { %v642_v4 = vadd.f32 %v641_v2, %v639_v3 }
 0x208   : > { %643 = vst [vmem:[%s258_s27] sm:$0xff] %v642_v4 }
 0x209   : > { %1081 = shalt.err (!%p1078_p11)
}
 0x20a   : > { %s1082_s29 = scalar_lea.hbm %s658_s30, 128  ;;  %s1086_s14 = scalar_lea.hbm %s1600_s8, 512 }
 0x20b   : > { %p1083_p12 = scmp.ne.s32.totalorder %s658_s30, %s1082_s29  ;;  %p1087_p2 = scmp.lt.s32.totalorder %s658_s30, %s1600_s8 }
 0x20c   : > { %p1088_p5 = scmp.lt.s32.totalorder %s1086_s14, %s1082_s29 }
 0x20d   : > { %p1084_p3 = pnand %p1083_p12, %p1318_p0 }
 0x20e   : > { %p1089_p7 = por %p1088_p5, %p1087_p2 }
 0x20f   : > { %p1085_p13 = pneg %p1084_p3 }
 0x211   : > { %p1090_p4 = pnand %p1089_p7, %p1085_p13 }
 0x213   : > { %1093 = shalt.err (!%p1090_p4)
}
 0x214   : > { %936 = dma.vmem_to_hbm [thread:$0]  (%p1318_p0), %s661_s15, 128, %s658_s30, %s645_s12  }
 0x215 PF: > { %p947_p6 = scmp.ge.s32.totalorder %s1188_s28, 2  ;;  %s672_s27 = sand.u32 1, %s1148_s18  }
 0x216   : > { %s673_s25 = scalar_lea.sflag [#allocation5], %s672_s27 }
 0x217   : > { %p943_p8 = pnand %p947_p6, %p1322_p1 }
 0x219   : > { %p944_p9 = pneg %p943_p8 }
 0x21b   : > { %1143 = dma.done.wait (%p944_p9), %s673_s25, 128  }
 0x21c   : > { %1145 = vsyncadd (%p944_p9), %s673_s25, 4294967168  ;;  %s21_s28 = sadd.s32 1, %s1188_s28   ;;  %s1601_s4 = smov %s1311_s21 }
 0x21d   : > { %p18_p10 = scmp.ge.s32.totalorder %s21_s28, 6   ;;  %s1602_s24 = sld [smem:[#allocation9_spill]] }
 0x21e   : > { %s1603_s25 = sld [smem:[#allocation10_spill]]  ;;  %s1606_s18 = smov %s1152_s19 }
 0x21f   : > { %s1604_s26 = sld [smem:[#allocation11_spill]]  ;;  %s1607_s19 = smov %s1156_s20 }
 0x220   : > { %s1605_s27 = sld [smem:[#allocation12_spill]]  ;;  %s1608_s20 = smov %s1316_s5 }
 0x221   : > { %s1609_s21 = smov %s1164_s22  ;;  %s1610_s22 = smov %s1168_s23 }
 0x222   : > { %s1611_s23 = smov %s1601_s4  ;;  %20 = sbr.rel (!%p18_p10) target bundleno = 12 (0xc), region = 91 }
 0x227   :  { %678 = vsyncpa [#allocation4], 1 }
 0x228   :  { %680 = vsyncpa [#allocation4 + $0x1], 1 }
 0x229   :  { %681 = vsyncpa [#allocation5], 1 }
 0x22a   :  { %683 = vsyncpa [#allocation5 + $0x1], 1 }

</bundles_post_ra>
